<compile_context>
chip_gen: v7x
topology: tpu7x:2x2x1
jax: 0.10.0
libtpu: 0.0.40
codegen_flags: <defaults>
</compile_context>

<pallas_src>
import functools
import math

import jax
import jax.numpy as jnp
from jax.experimental import pallas as pl
from jax.experimental.pallas import tpu as pltpu

NUM_CLASSES = 20
ALPHA = 0.25
EPS = 1e-5
_CLIP_LO = -math.log(1.0 - EPS)   # lower bound of -log(pt) after the EPS clip
_CLIP_HI = -math.log(EPS)         # upper bound of -log(pt) after the EPS clip

_MAX_TILE_LANES = 32768           # review item 1 (fits ~13 MiB VMEM w/ 2x buffering)
_MIN_LANES_PER_CORE = 8192        # only engage a 2nd TensorCore above this (item 4)
_VMEM_LIMIT_BYTES = 32 * 1024 * 1024


def _cdiv(a, b):
    return -(-a // b)


def _round_up(x, m):
    return _cdiv(x, m) * m


def _as_f32(x):
    return x if x.dtype == jnp.float32 else x.astype(jnp.float32)


def _detect_tensorcore_count():
    """Best-effort TensorCore count addressable by one pallas_call (v7x: 2)."""
    for get in (lambda: pltpu.get_tpu_info(), lambda: jax.devices()[0]):
        try:
            obj = get()
        except Exception:
            continue
        for name in ("num_cores", "num_tensorcores", "tensorcores_per_chip",
                     "core_count"):
            val = getattr(obj, name, None)
            try:
                val = int(val)
            except (TypeError, ValueError):
                continue
            if val >= 1:
                return min(val, 2)
    return 1


def _focal_kernel(loc_ref, cls_ref, tgt_ref,            # inputs
                  loc_out, cls_out, npos_out,            # outputs (per-core partials)
                  acc_loc, acc_cls, acc_n,               # (1, T) scratch rows
                  *, n_total, exact_cover):
    step = pl.program_id(1)
    tile = tgt_ref.shape[1]

    # Reset the per-core row accumulators at the start of each core's span.
    @pl.when(step == 0)
    def _():
        acc_loc[...] = jnp.zeros_like(acc_loc)
        acc_cls[...] = jnp.zeros_like(acc_cls)
        acc_n[...] = jnp.zeros_like(acc_n)

    tgt = tgt_ref[...]                                   # (1, T) int32
    if exact_cover:
        # Grid covers exactly n_total anchors: no tail mask needed (static skip).
        pos = tgt > 0
        pos_neg = tgt > -1
    else:
        core = pl.program_id(0)
        start = (core * pl.num_programs(1) + step) * tile
        lane = jax.lax.broadcasted_iota(jnp.int32, (1, tile), 1)
        valid = (lane + start) < n_total                 # pad-free ragged tail
        pos = valid & (tgt > 0)
        pos_neg = valid & (tgt > -1)

    acc_n[...] = acc_n[...] + jnp.where(pos, 1.0, 0.0)

    # ---- SmoothL1 (sum) over positive anchors ----------------------------
    # loc_ref rows 0..3 = predictions, rows 4..7 = targets (packed block).
    d = loc_ref[pl.ds(0, 4), :] - loc_ref[pl.ds(4, 4), :]        # (4, T)
    ad = jnp.abs(d)
    sl1 = jnp.where(ad < 1.0, 0.5 * d * d, ad - 0.5)
    loc_row = jnp.sum(sl1, axis=0, keepdims=True)                # (1, T) XLU reduce
    acc_loc[...] = acc_loc[...] + jnp.where(pos, loc_row, 0.0)

    # ---- focal_loss_alt (sum) over non-ignored anchors --------------------
    x = cls_ref[...]                                             # (C, T)
    cls_idx = jax.lax.broadcasted_iota(jnp.int32, x.shape, 0)    # class on sublanes
    is_t = (tgt - 1) == cls_idx                                  # boolean one-hot
    two_x = x + x
    z = jnp.where(is_t, two_x + 1.0, 1.0 - two_x)                # sign fold
    # stable softplus(-z) = -log(sigmoid(z)); the clamp reproduces the EPS clip.
    nll = jnp.maximum(-z, 0.0) + jnp.log(1.0 + jnp.exp(-jnp.abs(z)))
    nll = jnp.clip(nll, _CLIP_LO, _CLIP_HI)
    coeff = jnp.where(is_t, 0.5 * ALPHA, 0.5 * (1.0 - ALPHA))    # 0.125 / 0.375
    cls_row = jnp.sum(coeff * nll, axis=0, keepdims=True)        # (1, T) XLU reduce
    acc_cls[...] = acc_cls[...] + jnp.where(pos_neg, cls_row, 0.0)

    # ---- deferred cross-lane reductions + scalar stores (once per core) ---
    @pl.when(step == pl.num_programs(1) - 1)
    def _():
        loc_out[...] = jnp.zeros_like(loc_out) + jnp.sum(acc_loc[...])
        cls_out[...] = jnp.zeros_like(cls_out) + jnp.sum(acc_cls[...])
        npos_out[...] = jnp.zeros_like(npos_out) + jnp.sum(acc_n[...])


def _partial_sums(loc8, clsT, tgt_row, *, max_tile_lanes, num_cores):
    """loc8: (8, N) f32, clsT: (C, N) f32, tgt_row: (1, N) int32 -> 3 scalars."""
    n_total = tgt_row.shape[1]
    num_classes = clsT.shape[0]

    if num_cores is None:
        num_cores = _detect_tensorcore_count()
    # Only engage extra cores when each gets a meaningful slice (item 4).
    num_cores = max(1, min(int(num_cores), _cdiv(n_total, _MIN_LANES_PER_CORE)))

    lanes_per_core = _cdiv(n_total, num_cores)
    tile_lanes = min(int(max_tile_lanes), _round_up(lanes_per_core, 128))
    tile_lanes = _round_up(tile_lanes, 128)
    tiles_per_core = _cdiv(lanes_per_core, tile_lanes)
    exact_cover = (num_cores * tiles_per_core * tile_lanes == n_total)

    def row_map(c, i):
        return (0, c * tiles_per_core + i)

    part_shape = jax.ShapeDtypeStruct((num_cores, 1, 1), jnp.float32)
    part_spec = pl.BlockSpec((1, 1, 1), lambda c, i: (c, 0, 0))

    if num_cores > 1:
        dim_sem = (pltpu.CORE_PARALLEL, pltpu.ARBITRARY)   # v7x: split anchors over TCs
    else:
        dim_sem = (pltpu.ARBITRARY, pltpu.ARBITRARY)

    kernel = functools.partial(_focal_kernel, n_total=n_total,
                               exact_cover=exact_cover)

    # TODO(synk): if DMA is still exposed on v5e, add pipeline_mode=pl.Buffered(3)
    # on the cls spec and ship int8 targets (review item 9).
    loc_parts, cls_parts, npos_parts = pl.pallas_call(
        kernel,
        out_shape=(part_shape, part_shape, part_shape),
        grid_spec=pltpu.PrefetchScalarGridSpec(
            num_scalar_prefetch=0,
            grid=(num_cores, tiles_per_core),
            in_specs=[
                pl.BlockSpec((8, tile_lanes), row_map),
                pl.BlockSpec((num_classes, tile_lanes), row_map),
                pl.BlockSpec((1, tile_lanes), row_map),
            ],
            out_specs=(part_spec, part_spec, part_spec),
            scratch_shapes=[
                pltpu.VMEM((1, tile_lanes), jnp.float32),
                pltpu.VMEM((1, tile_lanes), jnp.float32),
                pltpu.VMEM((1, tile_lanes), jnp.float32),
            ]),
        compiler_params=pltpu.CompilerParams(
            dimension_semantics=dim_sem,
            vmem_limit_bytes=_VMEM_LIMIT_BYTES),
    )(loc8, clsT, tgt_row)

    return jnp.sum(loc_parts), jnp.sum(cls_parts), jnp.sum(npos_parts)


def _pack_inputs(loc_preds, loc_targets, cls_preds, cls_targets, num_classes):
    """Build the lane-dense kernel layout (anchors on the 128-wide lane axis)."""
    B, A = cls_targets.shape
    N = B * A
    lp = _as_f32(loc_preds.reshape(N, 4))
    lt = _as_f32(loc_targets.reshape(N, 4))
    loc8 = jnp.concatenate([lp, lt], axis=1).T                      # (8, N)
    clsT = _as_f32(cls_preds.reshape(N, num_classes)).T             # (C, N)
    tgt = cls_targets.reshape(1, N)
    if tgt.dtype != jnp.int32:
        tgt = tgt.astype(jnp.int32)
    return loc8, clsT, tgt


@functools.partial(jax.jit,
                   static_argnames=("num_classes", "max_tile_lanes", "num_cores"))
def focal_loss_forward(loc_preds, loc_targets, cls_preds, cls_targets,
                       num_classes=NUM_CLASSES,
                       max_tile_lanes=_MAX_TILE_LANES,
                       num_cores=None):
    loc8, clsT, tgt = _pack_inputs(loc_preds, loc_targets, cls_preds,
                                   cls_targets, num_classes)
    loc_loss, cls_loss, num_pos = _partial_sums(
        loc8, clsT, tgt, max_tile_lanes=max_tile_lanes, num_cores=num_cores)
    # Mirrors the PyTorch module exactly: no guard against num_pos == 0.
    loss = (loc_loss + cls_loss) / num_pos
    return loss, loc_loss, cls_loss, num_pos


@functools.partial(jax.jit, static_argnames=("max_tile_lanes", "num_cores"))
def focal_loss_forward_packed(loc8, clsT, cls_targets_row,
                              max_tile_lanes=_MAX_TILE_LANES,
                              num_cores=None):
    """Entry point for producers that already emit the lane-dense layout
    (review item 2a): loc8 (8, N) f32 [preds rows 0..3, targets rows 4..7],
    clsT (C, N) f32, cls_targets_row (1, N) int32.  No wrapper copies at all."""
    tgt = cls_targets_row
    if tgt.ndim == 1:
        tgt = tgt.reshape(1, -1)
    if tgt.dtype != jnp.int32:
        tgt = tgt.astype(jnp.int32)
    loc_loss, cls_loss, num_pos = _partial_sums(
        _as_f32(loc8), _as_f32(clsT), tgt,
        max_tile_lanes=max_tile_lanes, num_cores=num_cores)
    loss = (loc_loss + cls_loss) / num_pos
    return loss, loc_loss, cls_loss, num_pos


def _reference(loc_preds, loc_targets, cls_preds, cls_targets,
               num_classes=NUM_CLASSES):
    """Pure-JAX reference mirroring the PyTorch module semantics."""
    pos = (cls_targets > 0).astype(jnp.float32)           # (B, A)
    pos_neg = (cls_targets > -1).astype(jnp.float32)      # (B, A)
    num_pos = jnp.sum(pos)

    d = loc_preds - loc_targets
    ad = jnp.abs(d)
    sl1 = jnp.where(ad < 1.0, 0.5 * d * d, ad - 0.5)
    loc_loss = jnp.sum(sl1 * pos[..., None])

    t = jax.nn.one_hot(cls_targets, 1 + num_classes)[..., 1:]
    xt = cls_preds * (2.0 * t - 1.0)
    pt = jnp.clip(jax.nn.sigmoid(2.0 * xt + 1.0), EPS, 1.0 - EPS)
    w = ALPHA * t + (1.0 - ALPHA) * (1.0 - t)
    cls_loss = jnp.sum((-w * jnp.log(pt) * 0.5) * pos_neg[..., None])

    return (loc_loss + cls_loss) / num_pos, loc_loss, cls_loss, num_pos


if __name__ == "__main__":
    # ---- Case 1: small demo shapes (exactly covered by a single tile) -----
    batch, anchors = 2, 128
    k1, k2, k3, k4 = jax.random.split(jax.random.PRNGKey(0), 4)

    loc_preds = jax.random.normal(k1, (batch, anchors, 4), dtype=jnp.float32)
    loc_targets = jax.random.normal(k2, (batch, anchors, 4), dtype=jnp.float32)
    cls_preds = jax.random.normal(k3, (batch, anchors, NUM_CLASSES),
                                  dtype=jnp.float32)
    # targets in {-1 (ignore), 0 (background), 1..NUM_CLASSES}
    cls_targets = jax.random.randint(k4, (batch, anchors), -1,
                                     NUM_CLASSES + 1, dtype=jnp.int32)

    loss, loc_l, cls_l, npos = focal_loss_forward(
        loc_preds, loc_targets, cls_preds, cls_targets)
    jax.block_until_ready(loss)

    ref_loss, ref_loc, ref_cls, ref_npos = _reference(
        loc_preds, loc_targets, cls_preds, cls_targets)

    assert jnp.allclose(loss, ref_loss, rtol=2e-5, atol=1e-3), (loss, ref_loss)
    assert jnp.allclose(loc_l, ref_loc, rtol=2e-5, atol=1e-3), (loc_l, ref_loc)
    assert jnp.allclose(cls_l, ref_cls, rtol=2e-5, atol=1e-3), (cls_l, ref_cls)
    assert jnp.allclose(npos, ref_npos), (npos, ref_npos)

    print('loc_loss: %.3f | cls_loss: %.3f' %
          (float(loc_l) / float(npos), float(cls_l) / float(npos)), end=' | ')
    print()

    # ---- Case 2: ragged anchor count (exercises the pad-free tail mask) ---
    b2, a2 = 3, 1000   # N = 3000, tile rounds up to 3072 -> 72 masked lanes
    q1, q2, q3, q4 = jax.random.split(jax.random.PRNGKey(1), 4)
    lp2 = jax.random.normal(q1, (b2, a2, 4), dtype=jnp.float32)
    lt2 = jax.random.normal(q2, (b2, a2, 4), dtype=jnp.float32)
    cp2 = jax.random.normal(q3, (b2, a2, NUM_CLASSES), dtype=jnp.float32)
    ct2 = jax.random.randint(q4, (b2, a2), -1, NUM_CLASSES + 1, dtype=jnp.int32)

    loss2, loc2, cls2, npos2 = focal_loss_forward(lp2, lt2, cp2, ct2)
    jax.block_until_ready(loss2)
    r2 = _reference(lp2, lt2, cp2, ct2)
    assert jnp.allclose(loss2, r2[0], rtol=2e-5, atol=1e-3), (loss2, r2[0])
    assert jnp.allclose(loc2, r2[1], rtol=2e-5, atol=1e-3), (loc2, r2[1])
    assert jnp.allclose(cls2, r2[2], rtol=2e-5, atol=1e-3), (cls2, r2[2])
    assert jnp.allclose(npos2, r2[3]), (npos2, r2[3])

    print("KERNEL_OK")
</pallas_src>

<mosaic_0001>
module attributes {stable_mosaic.version = 11 : i64} {
  func.func @_focal_kernel(%arg0: i32, %arg1: i32, %arg2: memref<8x256xf32, #tpu.memory_space<vmem>>, %arg3: memref<20x256xf32, #tpu.memory_space<vmem>>, %arg4: memref<1x256xi32, #tpu.memory_space<vmem>>, %arg5: memref<1x1x1xf32, #tpu.memory_space<vmem>>, %arg6: memref<1x1x1xf32, #tpu.memory_space<vmem>>, %arg7: memref<1x1x1xf32, #tpu.memory_space<vmem>>, %arg8: memref<1x256xf32, #tpu.memory_space<vmem>>, %arg9: memref<1x256xf32, #tpu.memory_space<vmem>>, %arg10: memref<1x256xf32, #tpu.memory_space<vmem>>) attributes {dimension_semantics = [#tpu.dimension_semantics<arbitrary>, #tpu.dimension_semantics<arbitrary>], iteration_bounds = array<i64: 1, 1>, scalar_prefetch = 0 : i64, scratch_operands = 3 : i64, tpu.core_type = #tpu.core_type<tc>, window_params = [{transform_indices = @transform_0, window_bounds = array<i64: 8, 256>}, {transform_indices = @transform_1, window_bounds = array<i64: 20, 256>}, {transform_indices = @transform_2, window_bounds = array<i64: 1, 256>}, {transform_indices = @transform_3, window_bounds = array<i64: 1, 1, 1>}, {transform_indices = @transform_4, window_bounds = array<i64: 1, 1, 1>}, {transform_indices = @transform_5, window_bounds = array<i64: 1, 1, 1>}]} {
    %c0_i32 = arith.constant 0 : i32
    %0 = arith.cmpi eq, %arg1, %c0_i32 : i32
    %1 = arith.extui %0 : i1 to i32
    %c0_i32_0 = arith.constant 0 : i32
    %2 = arith.cmpi ne, %1, %c0_i32_0 : i32
    scf.if %2 {
      %cst_40 = arith.constant 0.000000e+00 : f32
      %75 = vector.broadcast %cst_40 : f32 to vector<1x256xf32>
      %c0_41 = arith.constant 0 : index
      %c0_42 = arith.constant 0 : index
      %76 = vector.load %arg8[%c0_41, %c0_42] : memref<1x256xf32, #tpu.memory_space<vmem>>, vector<1x256xf32>
      tpu.vector_store %arg8[%c0_41, %c0_42], %75 {strides = array<i32>} : memref<1x256xf32, #tpu.memory_space<vmem>>, vector<1x256xf32>,
      %cst_43 = arith.constant 0.000000e+00 : f32
      %77 = vector.broadcast %cst_43 : f32 to vector<1x256xf32>
      %c0_44 = arith.constant 0 : index
      %c0_45 = arith.constant 0 : index
      %78 = vector.load %arg9[%c0_44, %c0_45] : memref<1x256xf32, #tpu.memory_space<vmem>>, vector<1x256xf32>
      tpu.vector_store %arg9[%c0_44, %c0_45], %77 {strides = array<i32>} : memref<1x256xf32, #tpu.memory_space<vmem>>, vector<1x256xf32>,
      %cst_46 = arith.constant 0.000000e+00 : f32
      %79 = vector.broadcast %cst_46 : f32 to vector<1x256xf32>
      %c0_47 = arith.constant 0 : index
      %c0_48 = arith.constant 0 : index
      %80 = vector.load %arg10[%c0_47, %c0_48] : memref<1x256xf32, #tpu.memory_space<vmem>>, vector<1x256xf32>
      tpu.vector_store %arg10[%c0_47, %c0_48], %79 {strides = array<i32>} : memref<1x256xf32, #tpu.memory_space<vmem>>, vector<1x256xf32>,
    } else {
    }
    %c0 = arith.constant 0 : index
    %c0_1 = arith.constant 0 : index
    %3 = vector.load %arg4[%c0, %c0_1] : memref<1x256xi32, #tpu.memory_space<vmem>>, vector<1x256xi32>
    %c0_i32_2 = arith.constant 0 : i32
    %4 = vector.broadcast %c0_i32_2 : i32 to vector<1x256xi32>
    %5 = arith.cmpi sgt, %3, %4 : vector<1x256xi32>
    %c-1_i32 = arith.constant -1 : i32
    %6 = vector.broadcast %c-1_i32 : i32 to vector<1x256xi32>
    %7 = arith.cmpi sgt, %3, %6 : vector<1x256xi32>
    %c0_3 = arith.constant 0 : index
    %c0_4 = arith.constant 0 : index
    %8 = vector.load %arg10[%c0_3, %c0_4] : memref<1x256xf32, #tpu.memory_space<vmem>>, vector<1x256xf32>
    %cst = arith.constant 1.000000e+00 : f32
    %cst_5 = arith.constant 0.000000e+00 : f32
    %9 = vector.broadcast %cst : f32 to vector<1x256xf32>
    %10 = vector.broadcast %cst_5 : f32 to vector<1x256xf32>
    %11 = arith.select %5, %9, %10 : vector<1x256xi1>, vector<1x256xf32>
    %12 = arith.addf %8, %11 : vector<1x256xf32>
    %c0_6 = arith.constant 0 : index
    %c0_7 = arith.constant 0 : index
    %13 = vector.load %arg10[%c0_6, %c0_7] : memref<1x256xf32, #tpu.memory_space<vmem>>, vector<1x256xf32>
    tpu.vector_store %arg10[%c0_6, %c0_7], %12 {strides = array<i32>} : memref<1x256xf32, #tpu.memory_space<vmem>>, vector<1x256xf32>,
    %c0_8 = arith.constant 0 : index
    %c0_9 = arith.constant 0 : index
    %14 = vector.load %arg2[%c0_8, %c0_9] : memref<8x256xf32, #tpu.memory_space<vmem>>, vector<4x256xf32>
    %c4 = arith.constant 4 : index
    %c0_10 = arith.constant 0 : index
    %15 = vector.load %arg2[%c4, %c0_10] : memref<8x256xf32, #tpu.memory_space<vmem>>, vector<4x256xf32>
    %16 = arith.subf %14, %15 : vector<4x256xf32>
    %17 = math.absf %16 : vector<4x256xf32>
    %cst_11 = arith.constant 1.000000e+00 : f32
    %18 = vector.broadcast %cst_11 : f32 to vector<4x256xf32>
    %19 = arith.cmpf olt, %17, %18 : vector<4x256xf32>
    %cst_12 = arith.constant 5.000000e-01 : f32
    %20 = vector.broadcast %cst_12 : f32 to vector<4x256xf32>
    %21 = arith.mulf %20, %16 : vector<4x256xf32>
    %22 = arith.mulf %21, %16 : vector<4x256xf32>
    %cst_13 = arith.constant 5.000000e-01 : f32
    %23 = vector.broadcast %cst_13 : f32 to vector<4x256xf32>
    %24 = arith.subf %17, %23 : vector<4x256xf32>
    %25 = arith.select %19, %22, %24 : vector<4x256xi1>, vector<4x256xf32>
    %cst_14 = arith.constant dense<0.000000e+00> : vector<256xf32>
    %26 = vector.multi_reduction <add>, %25, %cst_14 [0] : vector<4x256xf32> to vector<256xf32>
    %27 = vector.shape_cast %26 : vector<256xf32> to vector<1x256xf32>
    %c0_15 = arith.constant 0 : index
    %c0_16 = arith.constant 0 : index
    %28 = vector.load %arg8[%c0_15, %c0_16] : memref<1x256xf32, #tpu.memory_space<vmem>>, vector<1x256xf32>
    %cst_17 = arith.constant 0.000000e+00 : f32
    %29 = vector.broadcast %cst_17 : f32 to vector<1x256xf32>
    %30 = arith.select %5, %27, %29 : vector<1x256xi1>, vector<1x256xf32>
    %31 = arith.addf %28, %30 : vector<1x256xf32>
    %c0_18 = arith.constant 0 : index
    %c0_19 = arith.constant 0 : index
    %32 = vector.load %arg8[%c0_18, %c0_19] : memref<1x256xf32, #tpu.memory_space<vmem>>, vector<1x256xf32>
    tpu.vector_store %arg8[%c0_18, %c0_19], %31 {strides = array<i32>} : memref<1x256xf32, #tpu.memory_space<vmem>>, vector<1x256xf32>,
    %c0_20 = arith.constant 0 : index
    %c0_21 = arith.constant 0 : index
    %33 = vector.load %arg3[%c0_20, %c0_21] : memref<20x256xf32, #tpu.memory_space<vmem>>, vector<20x256xf32>
    %34 = tpu.iota {dimensions = array<i32: 0>} : vector<20x256xi32>
    %c1_i32 = arith.constant 1 : i32
    %35 = vector.broadcast %c1_i32 : i32 to vector<1x256xi32>
    %36 = arith.subi %3, %35 : vector<1x256xi32>
    %37 = vector.broadcast %36 : vector<1x256xi32> to vector<20x256xi32>
    %38 = arith.cmpi eq, %37, %34 : vector<20x256xi32>
    %39 = arith.addf %33, %33 : vector<20x256xf32>
    %cst_22 = arith.constant 1.000000e+00 : f32
    %40 = vector.broadcast %cst_22 : f32 to vector<20x256xf32>
    %41 = arith.addf %39, %40 : vector<20x256xf32>
    %cst_23 = arith.constant 1.000000e+00 : f32
    %42 = vector.broadcast %cst_23 : f32 to vector<20x256xf32>
    %43 = arith.subf %42, %39 : vector<20x256xf32>
    %44 = arith.select %38, %41, %43 : vector<20x256xi1>, vector<20x256xf32>
    %cst_24 = arith.constant 0.000000e+00 : f32
    %45 = vector.broadcast %cst_24 : f32 to vector<20x256xf32>
    %46 = arith.subf %45, %44 : vector<20x256xf32>
    %cst_25 = arith.constant 0.000000e+00 : f32
    %47 = vector.broadcast %cst_25 : f32 to vector<20x256xf32>
    %48 = arith.maximumf %46, %47 : vector<20x256xf32>
    %49 = math.absf %44 : vector<20x256xf32>
    %cst_26 = arith.constant 0.000000e+00 : f32
    %50 = vector.broadcast %cst_26 : f32 to vector<20x256xf32>
    %51 = arith.subf %50, %49 : vector<20x256xf32>
    %52 = math.exp %51 : vector<20x256xf32>
    %cst_27 = arith.constant 1.000000e+00 : f32
    %53 = vector.broadcast %cst_27 : f32 to vector<20x256xf32>
    %54 = arith.addf %53, %52 : vector<20x256xf32>
    %55 = math.log %54 : vector<20x256xf32>
    %56 = arith.addf %48, %55 : vector<20x256xf32>
    %cst_28 = arith.constant 1.00000498E-5 : f32
    %cst_29 = arith.constant 11.5129251 : f32
    %57 = vector.broadcast %cst_28 : f32 to vector<20x256xf32>
    %58 = arith.maximumf %57, %56 : vector<20x256xf32>
    %59 = vector.broadcast %cst_29 : f32 to vector<20x256xf32>
    %60 = arith.minimumf %59, %58 : vector<20x256xf32>
    %cst_30 = arith.constant 1.250000e-01 : f32
    %cst_31 = arith.constant 3.750000e-01 : f32
    %61 = vector.broadcast %cst_30 : f32 to vector<20x256xf32>
    %62 = vector.broadcast %cst_31 : f32 to vector<20x256xf32>
    %63 = arith.select %38, %61, %62 : vector<20x256xi1>, vector<20x256xf32>
    %64 = arith.mulf %63, %60 : vector<20x256xf32>
    %cst_32 = arith.constant dense<0.000000e+00> : vector<256xf32>
    %65 = vector.multi_reduction <add>, %64, %cst_32 [0] : vector<20x256xf32> to vector<256xf32>
    %66 = vector.shape_cast %65 : vector<256xf32> to vector<1x256xf32>
    %c0_33 = arith.constant 0 : index
    %c0_34 = arith.constant 0 : index
    %67 = vector.load %arg9[%c0_33, %c0_34] : memref<1x256xf32, #tpu.memory_space<vmem>>, vector<1x256xf32>
    %cst_35 = arith.constant 0.000000e+00 : f32
    %68 = vector.broadcast %cst_35 : f32 to vector<1x256xf32>
    %69 = arith.select %7, %66, %68 : vector<1x256xi1>, vector<1x256xf32>
    %70 = arith.addf %67, %69 : vector<1x256xf32>
    %c0_36 = arith.constant 0 : index
    %c0_37 = arith.constant 0 : index
    %71 = vector.load %arg9[%c0_36, %c0_37] : memref<1x256xf32, #tpu.memory_space<vmem>>, vector<1x256xf32>
    tpu.vector_store %arg9[%c0_36, %c0_37], %70 {strides = array<i32>} : memref<1x256xf32, #tpu.memory_space<vmem>>, vector<1x256xf32>,
    %c0_i32_38 = arith.constant 0 : i32
    %72 = arith.cmpi eq, %arg1, %c0_i32_38 : i32
    %73 = arith.extui %72 : i1 to i32
    %c0_i32_39 = arith.constant 0 : i32
    %74 = arith.cmpi ne, %73, %c0_i32_39 : i32
    scf.if %74 {
      %cst_40 = arith.constant 0.000000e+00 : f32
      %75 = vector.broadcast %cst_40 : f32 to vector<1x1x1xf32>
      %c0_41 = arith.constant 0 : index
      %c0_42 = arith.constant 0 : index
      %76 = vector.load %arg8[%c0_41, %c0_42] : memref<1x256xf32, #tpu.memory_space<vmem>>, vector<1x256xf32>
      %77 = vector.shape_cast %76 : vector<1x256xf32> to vector<1x1x256xf32>
      %cst_43 = arith.constant dense<0.000000e+00> : vector<1xf32>
      %78 = vector.multi_reduction <add>, %77, %cst_43 [1, 2] : vector<1x1x256xf32> to vector<1xf32>
      %79 = vector.shape_cast %78 : vector<1xf32> to vector<1x1x1xf32>
      %80 = vector.extract %79[0, 0, 0] : f32 from vector<1x1x1xf32>
      %81 = vector.broadcast %80 : f32 to vector<1x1x1xf32>
      %82 = arith.addf %75, %81 : vector<1x1x1xf32>
      %c0_44 = arith.constant 0 : index
      %c0_45 = arith.constant 0 : index
      %c0_46 = arith.constant 0 : index
      %83 = vector.load %arg5[%c0_44, %c0_45, %c0_46] : memref<1x1x1xf32, #tpu.memory_space<vmem>>, vector<1x1x1xf32>
      tpu.vector_store %arg5[%c0_44, %c0_45, %c0_46], %82 {strides = array<i32>} : memref<1x1x1xf32, #tpu.memory_space<vmem>>, vector<1x1x1xf32>,
      %cst_47 = arith.constant 0.000000e+00 : f32
      %84 = vector.broadcast %cst_47 : f32 to vector<1x1x1xf32>
      %c0_48 = arith.constant 0 : index
      %c0_49 = arith.constant 0 : index
      %85 = vector.load %arg9[%c0_48, %c0_49] : memref<1x256xf32, #tpu.memory_space<vmem>>, vector<1x256xf32>
      %86 = vector.shape_cast %85 : vector<1x256xf32> to vector<1x1x256xf32>
      %cst_50 = arith.constant dense<0.000000e+00> : vector<1xf32>
      %87 = vector.multi_reduction <add>, %86, %cst_50 [1, 2] : vector<1x1x256xf32> to vector<1xf32>
      %88 = vector.shape_cast %87 : vector<1xf32> to vector<1x1x1xf32>
      %89 = vector.extract %88[0, 0, 0] : f32 from vector<1x1x1xf32>
      %90 = vector.broadcast %89 : f32 to vector<1x1x1xf32>
      %91 = arith.addf %84, %90 : vector<1x1x1xf32>
      %c0_51 = arith.constant 0 : index
      %c0_52 = arith.constant 0 : index
      %c0_53 = arith.constant 0 : index
      %92 = vector.load %arg6[%c0_51, %c0_52, %c0_53] : memref<1x1x1xf32, #tpu.memory_space<vmem>>, vector<1x1x1xf32>
      tpu.vector_store %arg6[%c0_51, %c0_52, %c0_53], %91 {strides = array<i32>} : memref<1x1x1xf32, #tpu.memory_space<vmem>>, vector<1x1x1xf32>,
      %cst_54 = arith.constant 0.000000e+00 : f32
      %93 = vector.broadcast %cst_54 : f32 to vector<1x1x1xf32>
      %c0_55 = arith.constant 0 : index
      %c0_56 = arith.constant 0 : index
      %94 = vector.load %arg10[%c0_55, %c0_56] : memref<1x256xf32, #tpu.memory_space<vmem>>, vector<1x256xf32>
      %95 = vector.shape_cast %94 : vector<1x256xf32> to vector<1x1x256xf32>
      %cst_57 = arith.constant dense<0.000000e+00> : vector<1xf32>
      %96 = vector.multi_reduction <add>, %95, %cst_57 [1, 2] : vector<1x1x256xf32> to vector<1xf32>
      %97 = vector.shape_cast %96 : vector<1xf32> to vector<1x1x1xf32>
      %98 = vector.extract %97[0, 0, 0] : f32 from vector<1x1x1xf32>
      %99 = vector.broadcast %98 : f32 to vector<1x1x1xf32>
      %100 = arith.addf %93, %99 : vector<1x1x1xf32>
      %c0_58 = arith.constant 0 : index
      %c0_59 = arith.constant 0 : index
      %c0_60 = arith.constant 0 : index
      %101 = vector.load %arg7[%c0_58, %c0_59, %c0_60] : memref<1x1x1xf32, #tpu.memory_space<vmem>>, vector<1x1x1xf32>
      tpu.vector_store %arg7[%c0_58, %c0_59, %c0_60], %100 {strides = array<i32>} : memref<1x1x1xf32, #tpu.memory_space<vmem>>, vector<1x1x1xf32>,
    } else {
    }
    return
  }
  func.func @transform_0(%arg0: i32, %arg1: i32) -> (i32, i32) {
    %c1_i32 = arith.constant 1 : i32
    %0 = arith.muli %arg0, %c1_i32 : i32
    %1 = arith.addi %0, %arg1 : i32
    %c0_i32 = arith.constant 0 : i32
    %c0_i32_0 = arith.constant 0 : i32
    return %c0_i32, %1 : i32, i32
  }
  func.func @transform_1(%arg0: i32, %arg1: i32) -> (i32, i32) {
    %c1_i32 = arith.constant 1 : i32
    %0 = arith.muli %arg0, %c1_i32 : i32
    %1 = arith.addi %0, %arg1 : i32
    %c0_i32 = arith.constant 0 : i32
    %c0_i32_0 = arith.constant 0 : i32
    return %c0_i32, %1 : i32, i32
  }
  func.func @transform_2(%arg0: i32, %arg1: i32) -> (i32, i32) {
    %c1_i32 = arith.constant 1 : i32
    %0 = arith.muli %arg0, %c1_i32 : i32
    %1 = arith.addi %0, %arg1 : i32
    %c0_i32 = arith.constant 0 : i32
    %c0_i32_0 = arith.constant 0 : i32
    return %c0_i32, %1 : i32, i32
  }
  func.func @transform_3(%arg0: i32, %arg1: i32) -> (i32, i32, i32) {
    %c0_i32 = arith.constant 0 : i32
    %c0_i32_0 = arith.constant 0 : i32
    %c0_i32_1 = arith.constant 0 : i32
    return %arg0, %c0_i32, %c0_i32_0 : i32, i32, i32
  }
  func.func @transform_4(%arg0: i32, %arg1: i32) -> (i32, i32, i32) {
    %c0_i32 = arith.constant 0 : i32
    %c0_i32_0 = arith.constant 0 : i32
    %c0_i32_1 = arith.constant 0 : i32
    return %arg0, %c0_i32, %c0_i32_0 : i32, i32, i32
  }
  func.func @transform_5(%arg0: i32, %arg1: i32) -> (i32, i32, i32) {
    %c0_i32 = arith.constant 0 : i32
    %c0_i32_0 = arith.constant 0 : i32
    %c0_i32_1 = arith.constant 0 : i32
    return %arg0, %c0_i32, %c0_i32_0 : i32, i32, i32
  }
}

</mosaic_0001>

<bundles_post_ra>
// kernel: focal_loss_forward.1
= control target key start
LH: loop header
LB: loop body
LE: loop exit
PB: predicated region body
PF: predicated region fallthrough
CT: control target
= control target key end

     0   :  { %11 = vsyncpa [#allocation6], 0  ;;  %v86_v0 = vlaneseq  ;;  %v589_v8 = vmov 0.0   ;;  %vm128_vm2 = vcmask 1043456   ;;  %s860_s0 = inlined_call_operand.vmem [shape: f32[8,256], index: 0, kind: input, shape index: {}]   ;;  %s861_s1 = inlined_call_operand.vmem [shape: f32[20,256], index: 1, kind: input, shape index: {}]   ;;  %s862_s2 = inlined_call_operand.vmem [shape: s32[1,256], index: 2, kind: input, shape index: {}]   ;;  %s863_s3 = inlined_call_operand.hbm [shape: f32[1,1,1], index: 3, kind: output, shape index: {0}]   ;;  %s864_s4 = inlined_call_operand.hbm [shape: f32[1,1,1], index: 4, kind: output, shape index: {1}]   ;;  %s865_s5 = inlined_call_operand.hbm [shape: f32[1,1,1], index: 5, kind: output, shape index: {2}]  }
   0x1   :  { %v104_v1 = vld [vmem:[%s860_s0] sm:$0xf]  ;;  %v105_v2 = vld [vmem:[%s860_s0 + $0x8] sm:$0xf]  ;;  %v106_v3 = vld [vmem:[%s860_s0] sm:$0xf0] }
   0x2   :  { %vm634_vm0 = vcmp.lt.s32.totalorder %v86_v0, 256  ;;  %v107_v5 = vld [vmem:[%s860_s0 + $0x8] sm:$0xf0]  ;;  %v110_v6 = vrot.slane %v106_v3, 4  ;;  %v641_v7 = vshrl.u32 %v86_v0, 7 }
   0x3   :  { %90 = vst.msk [vmem:[#allocation2] sm:$0x3] %vm634_vm0, %v589_v8  ;;  %91 = vst.msk [vmem:[#allocation3] sm:$0x3] %vm634_vm0, %v589_v8  ;;  %v652_v9 = vld [vmem:[%s862_s2] sm:$0x3] }
   0x4   :  { %92 = vst.msk [vmem:[#allocation4] sm:$0x3] %vm634_vm0, %v589_v8  ;;  %v111_v10 = vrot.slane %v107_v5, 4  ;;  %v114_v11 = vsub.f32 %v104_v1, %v110_v6  ;;  %vm94_vm1 = vcmp.gt.s32.totalorder %v652_v9, 0 }
   0x6   :  { %v115_v12 = vsub.f32 %v105_v2, %v111_v10 }
   0x7   :  { %12 = vsyncpa [#allocation8], 0  ;;  %v116_v13 = vand.u32 2147483647, %v114_v11  ;;  %v120_v14 = vmul.f32 0.5, %v114_v11  ;;  %v482_v15 = vadd.s32 4294967295, %v652_v9 }
   0x8   :  { %v657_v16 = vsub.s32 0, %v641_v7  ;;  %v97_v17 = vsel %vm94_vm1, 1.0, %v589_v8  ;;  %v117_v18 = vand.u32 2147483647, %v115_v12  ;;  %v121_v19 = vmul.f32 0.5, %v115_v12  ;;  %v165_v20 = vld [vmem:[%s861_s1] sm:$0xff] }
   0x9   :  { %v665_v21 = vsub.s32 1, %v641_v7  ;;  %vm667_vm3 = vcmp.lt.f32.partialorder %v116_v13, 1.0  ;;  %v122_v23 = vmul.f32 %v120_v14, %v114_v11  ;;  %v480_v24 = vadd.f32 -0.5, %v116_v13  ;;  %v166_v30 = vld [vmem:[%s861_s1 + $0x8] sm:$0xff]  ;;  %v167_v31 = vld [vmem:[%s861_s1 + $0x10] sm:$0xff]  ;;  %v168_v35 = vld [vmem:[%s861_s1 + $0x18] sm:$0xff] }
   0xa   :  { %v590_v25 = vmov 1966171168   ;;  %vm673_vm4 = vcmp.lt.f32.partialorder %v117_v18, 1.0  ;;  %v123_v28 = vmul.f32 %v121_v19, %v115_v12  ;;  %v481_v29 = vadd.f32 -0.5, %v117_v18  ;;  %v169_v36 = vld [vmem:[%s861_s1 + $0x20] sm:$0xf] }
   0xb   :  { %v671_v26 = vunpack.c.l.s4 %v590_v25  ;;  %v684_v32 = vadd.s32 8, %v641_v7  ;;  %v96_v33 = vld [vmem:[#allocation4] sm:$0x3]  ;;  %v126_v34 = vsel %vm667_vm3, %v122_v23, %v480_v24  ;;  %v695_v37 = vadd.s32 16, %v641_v7  ;;  %v170_v47 = vld [vmem:[%s861_s1 + $0x28] sm:$0xf] }
   0xc   :  { %v698_v38 = vrot.slane %v482_v15, %v657_v16  ;;  %v190_v39 = vadd.f32 %v165_v20, %v165_v20  ;;  %v98_v40 = vadd.f32 %v97_v17, %v96_v33  ;;  %v127_v41 = vsel %vm673_vm4, %v123_v28, %v481_v29  ;;  %s592_s1 = smov [#allocation5]  }
   0xd   :  { %v129_v42 = vsel %vm128_vm2, %v126_v34, 0.0  ;;  %v704_v43 = vrot.slane %v482_v15, %v665_v21  ;;  %v136_v45 = vsel %vm128_vm2, %v127_v41, 0.0  ;;  %v149_v46 = vunpack.c.0.s8 %v671_v26  ;;  %v143_v34 = vld [vmem:[#allocation2] sm:$0x3]  ;;  %s430_s13 = sshll.u32 %s592_s1, 4  ;;  %s431_s13 = int_to_ptr.vmem [resolvable:$true] %s430_s13 }
   0xe   :  { %v130_v44 = vrot.slane %v129_v42, 4  ;;  %v191_v48 = vadd.f32 %v166_v30, %v166_v30  ;;  %103 = vst.msk [vmem:[#allocation4] sm:$0x3] %vm634_vm0, %v98_v40  ;;  %v137_v49 = vrot.slane %v136_v45, 4  ;;  %v192_v50 = vadd.f32 %v167_v31, %v167_v31  ;;  %s519_s15 = scalar_lea.vmem %s431_s13, 16  ;;  %s523_s16 = scalar_lea.vmem %s431_s13, 32 }
   0xf   :  { %v193_v51 = vadd.f32 %v168_v35, %v168_v35  ;;  %v194_v52 = vadd.f32 %v169_v36, %v169_v36  ;;  %vm184_vm5 = vcmp.eq.s32.totalorder %v698_v38, %v641_v7  ;;  %vm186_vm6 = vcmp.eq.s32.totalorder %v698_v38, %v684_v32  ;;  %p520_p0 = scmp.ne.s32.totalorder %s431_s13, %s519_s15  ;;  %p524_p1 = scmp.lt.s32.totalorder %s431_s13, %s431_s13 }
  0x10   :  { %v131_v53 = vadd.f32 %v130_v44, %v129_v42  ;;  %vm188_vm7 = vcmp.eq.s32.totalorder %v698_v38, %v695_v37  ;;  %v138_v54 = vadd.f32 %v137_v49, %v136_v45  ;;  %vm185_vm8 = vcmp.eq.s32.totalorder %v704_v43, %v641_v7  ;;  %p525_p2 = scmp.lt.s32.totalorder %s523_s16, %s519_s15 }
  0x11   :  { %v195_v55 = vadd.f32 %v170_v47, %v170_v47  ;;  %v196_v56 = vadd.f32 1.0, %v190_v39  ;;  %v197_v58 = vadd.f32 1.0, %v191_v48  ;;  %v198_v59 = vadd.f32 1.0, %v192_v50 }
  0x12   :  { %v132_v57 = vrot.slane %v131_v53, 2  ;;  %v199_v60 = vadd.f32 1.0, %v193_v51  ;;  %v139_v61 = vrot.slane %v138_v54, 2  ;;  %v200_v62 = vadd.f32 1.0, %v194_v52  ;;  %p526_p3 = por %p525_p2, %p524_p1 }
  0x13   :  { %v202_v63 = vsub.f32 1.0, %v190_v39  ;;  %v203_v0 = vsub.f32 1.0, %v191_v48  ;;  %v204_v2 = vsub.f32 1.0, %v192_v50  ;;  %v205_v3 = vsub.f32 1.0, %v193_v51 }
  0x14   :  { %v133_v1 = vadd.f32 %v132_v57, %v131_v53  ;;  %v206_v5 = vsub.f32 1.0, %v194_v52  ;;  %v140_v6 = vadd.f32 %v139_v61, %v138_v54  ;;  %vm187_vm9 = vcmp.eq.s32.totalorder %v704_v43, %v684_v32  ;;  %p527_p4 = pnand %p526_p3, %p520_p0 }
  0x15   :  { %v201_v8 = vadd.f32 1.0, %v195_v55  ;;  %v207_v10 = vsub.f32 1.0, %v195_v55  ;;  %vm189_vm10 = vcmp.eq.s32.totalorder %v704_v43, %v695_v37  ;;  %v728_v13 = vsel %vm184_vm5, %v196_v56, %v202_v63  ;;  %v397_v48 = vld [vmem:[#allocation4] sm:$0x3] }
  0x16   :  { %v134_v11 = vrot.slane %v133_v1, 1  ;;  %v141_v12 = vrot.slane %v140_v6, 1  ;;  %v733_v14 = vsel %vm185_vm8, %v197_v58, %v203_v0  ;;  %v738_v17 = vsel %vm186_vm6, %v198_v59, %v204_v2 }
  0x17   :  { %v743_v18 = vsel %vm187_vm9, %v199_v60, %v205_v3  ;;  %v748_v19 = vsel %vm188_vm7, %v200_v62, %v206_v5  ;;  %v751_v22 = vsub.s32 %v149_v46, %v641_v7  ;;  %v756_v23 = vsel %vm189_vm10, %v201_v8, %v207_v10 }
  0x18   :  { %v135_v15 = vadd.f32 %v134_v11, %v133_v1  ;;  %v142_v20 = vadd.f32 %v141_v12, %v140_v6  ;;  %v226_v24 = vand.u32 2147483647, %v728_v13  ;;  %v227_v25 = vand.u32 2147483647, %v733_v14 }
  0x19   :  { %v228_v27 = vand.u32 2147483647, %v738_v17  ;;  %v229_v28 = vand.u32 2147483647, %v743_v18  ;;  %v230_v29 = vand.u32 2147483647, %v748_v19  ;;  %v402_v53 = vrot.slane %v397_v48, %v657_v16 }
  0x1a   :  { %v146_v26 = vcombine.low %v135_v15, %v142_v20  ;;  %v231_v30 = vand.u32 2147483647, %v756_v23  ;;  %v232_v31 = vsub.f32 0.0, %v226_v24  ;;  %v233_v33 = vsub.f32 0.0, %v227_v25 }
  0x1b   :  { %v234_v36 = vsub.f32 0.0, %v228_v27  ;;  %v235_v39 = vsub.f32 0.0, %v229_v28  ;;  %v236_v40 = vsub.f32 0.0, %v230_v29  ;;  %vm353_vm11 = vcmask 1040384  }
  0x1c   :  { %v153_v35 = vrot.slane %v146_v26, %v751_v22  ;;  %v237_v41 = vsub.f32 0.0, %v231_v30  ;;  %v238_v42 = vmul.f32 1.442695, %v232_v31  ;;  %v240_v44 = vmul.f32 1.442695, %v233_v33 }
  0x1d   :  { %v242_v46 = vmul.f32 1.442695, %v234_v36  ;;  %v244_v47 = vmul.f32 1.442695, %v235_v39  ;;  %v246_v49 = vmul.f32 1.442695, %v236_v40  ;;  %v406_v54 = vrot.slane %v397_v48, %v665_v21 }
  0x1e   :  { %v160_v45 = vrot.slane %v153_v35, %v751_v22  ;;  %495 = vpow2.f32 %v238_v42  ;;  %v248_v51 = vmul.f32 1.442695, %v237_v41  ;;  %v409_v55 = vsel %vm353_vm11, %v402_v53, 0.0 }
  0x1f   :  { %497 = vpow2.f32 %v240_v44  ;;  %v410_v56 = vsel %vm353_vm11, %v406_v54, 0.0  ;;  %v214_v24 = vsub.f32 0.0, %v728_v13  ;;  %v215_v25 = vsub.f32 0.0, %v733_v14 }
  0x20   :  { %v162_v50 = vsel %vm94_vm1, %v160_v45, 0.0  ;;  %499 = vpow2.f32 %v242_v46  ;;  %v411_v57 = vadd.f32 %v410_v56, %v409_v55  ;;  %v216_v26 = vsub.f32 0.0, %v738_v17 }
  0x21   :  { %v163_v52 = vadd.f32 %v162_v50, %v143_v34  ;;  %501 = vpow2.f32 %v244_v47  ;;  %v217_v27 = vsub.f32 0.0, %v743_v18  ;;  %v218_v28 = vsub.f32 0.0, %v748_v19 }
  0x22   :  { %503 = vpow2.f32 %v246_v49  ;;  %412 = vadd.xlane.f32.xlu1 %v411_v57  ;;  %v220_v29 = vmax.f32 %v214_v24, 0.0  ;;  %v219_v31 = vsub.f32 0.0, %v756_v23  ;;  %v221_v33 = vmax.f32 %v215_v25, 0.0 }
  0x23   :  { %164 = vst.msk [vmem:[#allocation2] sm:$0x3] %vm634_vm0, %v163_v52  ;;  %505 = vpow2.f32 %v248_v51  ;;  %v222_v35 = vmax.f32 %v216_v26, 0.0  ;;  %v223_v40 = vmax.f32 %v217_v27, 0.0  ;;  %v224_v42 = vmax.f32 %v218_v28, 0.0 }
  0x24   :  { %v225_v45 = vmax.f32 %v219_v31, 0.0  ;;  %v591_v52 = vmov 0.375   ;;  %vm95_vm12 = vcmp.gt.s32.totalorder %v652_v9, 4294967295  ;;  %vm368_vm13 = vcmask 0  }
  0x25   :  { %v286_v53 = vsel %vm184_vm5, 0.125, %v591_v52  ;;  %v287_v57 = vsel %vm185_vm8, 0.125, %v591_v52  ;;  %v290_v7 = vsel %vm188_vm7, 0.125, %v591_v52 }
  0x28   :  { %v496_v58 = vpop.eup %495 }
  0x29   :  { %v498_v59 = vpop.eup %497  ;;  %v250_v60 = vadd.f32 1.0, %v496_v58 }
  0x2a   :  { %v341_v61 = vld [vmem:[#allocation2] sm:$0x3]  ;;  %v500_v62 = vpop.eup %499  ;;  %v251_v63 = vadd.f32 1.0, %v498_v59 }
  0x2b   :  { %v346_v0 = vrot.slane %v341_v61, %v657_v16  ;;  %v350_v1 = vrot.slane %v341_v61, %v665_v21  ;;  %v502_v2 = vpop.eup %501  ;;  %v252_v3 = vadd.f32 1.0, %v500_v62  ;;  %507 = vlog2.f32 %v250_v60 }
  0x2c   :  { %v504_v5 = vpop.eup %503  ;;  %v253_v6 = vadd.f32 1.0, %v502_v2  ;;  %509 = vlog2.f32 %v251_v63  ;;  %v288_v61 = vsel %vm186_vm6, 0.125, %v591_v52 }
  0x2d   :  { %v354_v8 = vsel %vm353_vm11, %v346_v0, 0.0  ;;  %v355_v10 = vsel %vm353_vm11, %v350_v1, 0.0  ;;  %v506_v11 = vpop.eup %505  ;;  %v254_v12 = vadd.f32 1.0, %v504_v5  ;;  %511 = vlog2.f32 %v252_v3 }
  0x2e   :  { %v356_v15 = vadd.f32 %v355_v10, %v354_v8  ;;  %v255_v20 = vadd.f32 1.0, %v506_v11  ;;  %513 = vlog2.f32 %v253_v6  ;;  %v289_v0 = vsel %vm187_vm9, 0.125, %v591_v52 }
  0x2f   :  { %515 = vlog2.f32 %v254_v12  ;;  %v291_v8 = vsel %vm189_vm10, 0.125, %v591_v52 }
  0x30   :  { %357 = vadd.xlane.f32.xlu0 %v356_v15  ;;  %517 = vlog2.f32 %v255_v20 }
  0x35   :  { %v508_v30 = vpop.eup %507 }
  0x36   :  { %v510_v34 = vpop.eup %509  ;;  %v257_v36 = vmul.f32 0.6931472, %v508_v30 }
  0x37   :  { %v512_v39 = vpop.eup %511  ;;  %v259_v13 = vmul.f32 0.6931472, %v510_v34 }
  0x38   :  { %v514_v41 = vpop.eup %513  ;;  %v261_v14 = vmul.f32 0.6931472, %v512_v39  ;;  %v268_v44 = vadd.f32 %v257_v36, %v220_v29 }
  0x39   :  { %v516_v17 = vpop.eup %515  ;;  %v263_v18 = vmul.f32 0.6931472, %v514_v41  ;;  %v269_v46 = vadd.f32 %v259_v13, %v221_v33 }
  0x3a   :  { %v518_v19 = vpop.eup %517  ;;  %v265_v47 = vmul.f32 0.6931472, %v516_v17  ;;  %v270_v48 = vadd.f32 %v261_v14, %v222_v35  ;;  %v274_v49 = vmax.f32 %v268_v44, 1.000005e-05 }
  0x3b   :  { %v267_v23 = vmul.f32 0.6931472, %v518_v19  ;;  %v271_v50 = vadd.f32 %v263_v18, %v223_v40  ;;  %v275_v51 = vmax.f32 %v269_v46, 1.000005e-05 }
  0x3c   :  { %v272_v54 = vadd.f32 %v265_v47, %v224_v42  ;;  %v276_v55 = vmax.f32 %v270_v48, 1.000005e-05  ;;  %v280_v56 = vmin.f32 %v274_v49, 11.512925  ;;  %v316_v42 = vld [vmem:[#allocation3] sm:$0x3] }
  0x3d   :  { %v273_v58 = vadd.f32 %v267_v23, %v225_v45  ;;  %v277_v59 = vmax.f32 %v271_v50, 1.000005e-05  ;;  %v281_v60 = vmin.f32 %v275_v51, 11.512925 }
  0x3e   :  { %v278_v62 = vmax.f32 %v272_v54, 1.000005e-05  ;;  %v282_v63 = vmin.f32 %v276_v55, 11.512925  ;;  %v292_v1 = vmul.f32 %v286_v53, %v280_v56 }
  0x3f   :  { %v279_v2 = vmax.f32 %v273_v58, 1.000005e-05  ;;  %v283_v3 = vmin.f32 %v277_v59, 11.512925  ;;  %v293_v5 = vmul.f32 %v287_v57, %v281_v60 }
  0x40   :  { %v284_v6 = vmin.f32 %v278_v62, 11.512925  ;;  %v294_v10 = vmul.f32 %v288_v61, %v282_v63 }
  0x41   :  { %v285_v11 = vmin.f32 %v279_v2, 11.512925  ;;  %v295_v12 = vmul.f32 %v289_v0, %v283_v3 }
  0x42   :  { %v296_v15 = vmul.f32 %v290_v7, %v284_v6  ;;  %v298_v20 = vadd.f32 %v294_v10, %v292_v1 }
  0x43   :  { %v297_v32 = vmul.f32 %v291_v8, %v285_v11  ;;  %v307_v24 = vadd.f32 %v295_v12, %v293_v5 }
  0x44   :  { %v299_v25 = vsel %vm128_vm2, %v296_v15, 0.0 }
  0x45   :  { %v300_v26 = vadd.f32 %v299_v25, %v298_v20  ;;  %v308_v27 = vsel %vm128_vm2, %v297_v32, 0.0 }
  0x46   :  { %v309_v38 = vadd.f32 %v308_v27, %v307_v24 }
  0x47   :  { %v301_v28 = vrot.slane %v300_v26, 4 }
  0x48   :  { %v310_v29 = vrot.slane %v309_v38, 4 }
  0x49   :  { %v302_v30 = vadd.f32 %v301_v28, %v300_v26 }
  0x4a   :  { %v311_v31 = vadd.f32 %v310_v29, %v309_v38 }
  0x4b   :  { %v303_v33 = vrot.slane %v302_v30, 2 }
  0x4c   :  { %v312_v37 = vrot.slane %v311_v31, 2 }
  0x4d   :  { %v304_v43 = vadd.f32 %v303_v33, %v302_v30 }
  0x4e   :  { %v313_v34 = vadd.f32 %v312_v37, %v311_v31 }
  0x4f   :  { %v305_v35 = vrot.slane %v304_v43, 1 }
  0x50   :  { %v314_v36 = vrot.slane %v313_v34, 1 }
  0x51   :  { %v306_v39 = vadd.f32 %v305_v35, %v304_v43 }
  0x52   :  { %v315_v40 = vadd.f32 %v314_v36, %v313_v34 }
  0x54   :  { %v319_v13 = vcombine.low %v306_v39, %v315_v40 }
  0x56   :  { %v326_v41 = vrot.slane %v319_v13, %v751_v22 }
  0x58   :  { %v333_v14 = vrot.slane %v326_v41, %v751_v22 }
  0x5a   :  { %v335_v44 = vsel %vm95_vm12, %v333_v14, 0.0 }
  0x5b   :  { %v336_v17 = vadd.f32 %v335_v44, %v316_v42 }
  0x5d   :  { %337 = vst.msk [vmem:[#allocation3] sm:$0x3] %vm634_vm0, %v336_v17 }
  0x64   :  { %v370_v45 = vld [vmem:[#allocation3] sm:$0x3] }
  0x65   :  { %v375_v18 = vrot.slane %v370_v45, %v657_v16  ;;  %v379_v46 = vrot.slane %v370_v45, %v665_v21 }
  0x67   :  { %v382_v19 = vsel %vm353_vm11, %v375_v18, 0.0  ;;  %v383_v47 = vsel %vm353_vm11, %v379_v46, 0.0 }
  0x68   :  { %v384_v48 = vadd.f32 %v383_v47, %v382_v19 }
  0x6a   :  { %385 = vadd.xlane.f32.xlu0 %v384_v48 }
  0xaf   :  { %v413_v4 = vpop.xlane.xlu1 %412 }
  0xb0   :  { %v414_v53 = vrot.slane %v413_v4, 4 }
  0xb2   :  { %v415_v54 = vadd.f32 %v414_v53, %v413_v4 }
  0xb4   :  { %v416_v16 = vrot.slane %v415_v54, 2 }
  0xb6   :  { %v417_v57 = vadd.f32 %v416_v16, %v415_v54 }
  0xbd   :  { %v358_v9 = vpop.xlane.xlu0 %357 }
  0xbe   :  { %v359_v49 = vrot.slane %v358_v9, 4 }
  0xc0   :  { %v360_v23 = vadd.f32 %v359_v49, %v358_v9 }
  0xc2   :  { %v361_v22 = vrot.slane %v360_v23, 2 }
  0xc4   :  { %v362_v50 = vadd.f32 %v361_v22, %v360_v23 }
  0xc6   :  { %v363_v51 = vrot.slane %v362_v50, 1 }
  0xc8   :  { %v364_v52 = vadd.f32 %v363_v51, %v362_v50 }
  0xca   :  { %483 = vpush %v364_v52 }
  0xf7   :  { %v386_v55 = vpop.xlane.xlu0 %385 }
  0xf8   :  { %v387_v21 = vrot.slane %v386_v55, 4 }
  0xfa   :  { %v388_v56 = vadd.f32 %v387_v21, %v386_v55 }
  0xfb   :  { %s484_s14 = spop %483 }
  0xfc   :  { %v366_v58 = vstv %s484_s14  ;;  %v389_v59 = vrot.slane %v388_v56, 2 }
  0xfd   :  { %369 = vst.msk [vmem:[#allocation5] sm:$0x1] %vm368_vm13, %v366_v58 }
  0xfe   :  { %530 = shalt.err (!%p527_p4)
}
  0xff   :  { %s531_s19 = scalar_lea.hbm %s863_s3, 16 }
 0x100   :  { %p532_p5 = scmp.ne.s32.totalorder %s863_s3, %s531_s19  ;;  %p535_p6 = scmp.lt.u32.totalorder %s531_s19, %s863_s3 }
 0x102   :  { %p537_p7 = pnand %p535_p6, %p532_p5 }
 0x104   :  { %540 = shalt.err (!%p537_p7)
}
 0x105   :  { %433 = dma.vmem_to_hbm [thread:$0]  %s431_s13, 16, %s863_s3, [#allocation6]   ;;  %v390_v60 = vadd.f32 %v389_v59, %v388_v56  ;;  %v418_v61 = vrot.slane %v417_v57, 1 }
 0x106   :  { %s593_s26 = smov [#allocation7]   ;;  %s594_s0 = smov [#allocation9]  }
 0x107   :  { %v391_v62 = vrot.slane %v390_v60, 1  ;;  %v419_v0 = vadd.f32 %v418_v61, %v417_v57  ;;  %s440_s27 = sshll.u32 %s593_s26, 4  ;;  %s450_s2 = sshll.u32 %s594_s0, 4  ;;  %s441_s27 = int_to_ptr.vmem [resolvable:$true] %s440_s27  ;;  %s826_s2 = int_to_ptr.vmem [resolvable:$true] %s450_s2 }
 0x108   :  { %s541_s3 = scalar_lea.vmem %s441_s27, 16  ;;  %s545_s30 = scalar_lea.vmem %s441_s27, 32 }
 0x109   :  { %v392_v63 = vadd.f32 %v391_v62, %v390_v60  ;;  %p542_p8 = scmp.ne.s32.totalorder %s441_s27, %s541_s3  ;;  %p546_p9 = scmp.lt.s32.totalorder %s441_s27, %s441_s27 }
 0x10a   :  { %p547_p10 = scmp.lt.s32.totalorder %s545_s30, %s541_s3 }
 0x10b   :  { %485 = vpush %v392_v63 }
 0x10c   :  { %487 = vpush %v419_v0  ;;  %p548_p11 = por %p547_p10, %p546_p9 }
 0x10e   :  { %p549_p12 = pnand %p548_p11, %p542_p8 }
 0x13c   :  { %s486_s28 = spop %485 }
 0x13d   :  { %v394_v1 = vstv %s486_s28  ;;  %s488_s29 = spop %487 }
 0x13e   :  { %396 = vst.msk [vmem:[#allocation7] sm:$0x1] %vm368_vm13, %v394_v1  ;;  %v421_v2 = vstv %s488_s29 }
 0x13f   :  { %423 = vst.msk [vmem:[#allocation9] sm:$0x1] %vm368_vm13, %v421_v2 }
 0x140   :  { %552 = shalt.err (!%p549_p12)
}
 0x141   :  { %s553_s8 = scalar_lea.hbm %s864_s4, 16 }
 0x142   :  { %p554_p13 = scmp.ne.s32.totalorder %s864_s4, %s553_s8  ;;  %p557_p0 = scmp.lt.u32.totalorder %s553_s8, %s864_s4 }
 0x144   :  { %p559_p1 = pnand %p557_p0, %p554_p13 }
 0x146   :  { %562 = shalt.err (!%p559_p1)
}
 0x147   :  { %443 = dma.vmem_to_hbm [thread:$0]  %s441_s27, 16, %s864_s4, [#allocation8]  }
 0x148   :  { %s563_s14 = scalar_lea.vmem %s826_s2, 16  ;;  %s567_s15 = scalar_lea.vmem %s826_s2, 32 }
 0x149   :  { %p564_p2 = scmp.ne.s32.totalorder %s826_s2, %s563_s14  ;;  %p568_p3 = scmp.lt.s32.totalorder %s826_s2, %s826_s2 }
 0x14a   :  { %p569_p4 = scmp.lt.s32.totalorder %s567_s15, %s563_s14 }
 0x14c   :  { %p570_p5 = por %p569_p4, %p568_p3 }
 0x14e   :  { %p571_p6 = pnand %p570_p5, %p564_p2 }
 0x150   :  { %574 = shalt.err (!%p571_p6)
}
 0x151   :  { %s575_s18 = scalar_lea.hbm %s865_s5, 16 }
 0x152   :  { %p576_p7 = scmp.ne.s32.totalorder %s865_s5, %s575_s18  ;;  %p579_p8 = scmp.lt.u32.totalorder %s575_s18, %s865_s5 }
 0x154   :  { %p581_p9 = pnand %p579_p8, %p576_p7 }
 0x156   :  { %584 = shalt.err (!%p581_p9)
}
 0x157   :  { %453 = dma.vmem_to_hbm [thread:$0]  %s826_s2, 16, %s865_s5, [#allocation8]  }
 0x158   :  { %585 = dma.done.wait [#allocation6], 16  }
 0x159   :  { %586 = vsyncadd [#allocation6], 4294967280 }
 0x15a   :  { %587 = dma.done.wait [#allocation8], 32  }
 0x15b   :  { %588 = vsyncadd [#allocation8], 4294967264 }
 0x15c   :  { %463 = vsyncpa [#allocation6], 1 }
 0x15d   :  { %464 = vsyncpa [#allocation8], 1 }

</bundles_post_ra>
